<compile_context>
chip_gen: v7x
topology: tpu7x:2x2x1
jax: 0.10.0
libtpu: 0.0.40
codegen_flags: <defaults>
</compile_context>

<pallas_src>
import jax
import jax.numpy as jnp
from jax.experimental import pallas as pl
from jax.experimental.pallas import tpu as pltpu

_MIB = 1024 * 1024


def _round_up(a, b):
    return ((a + b - 1) // b) * b


def _maybe_pad2(a, rows, cols):
    pr, pc = rows - a.shape[0], cols - a.shape[1]
    if pr == 0 and pc == 0:
        return a
    return jnp.pad(a, ((0, pr), (0, pc)))


def _vmem_capacity_bytes():
    try:
        info = pltpu.get_tpu_info()
        cap = getattr(info, "vmem_capacity_bytes", None)
        if cap:
            return int(cap)
    except Exception:
        pass
    return 128 * _MIB  # v5e/v6e default; v7x reports 64 MiB when queryable


def _ffn_resident_kernel(x_ref, w1_ref, b1_ref, w2_ref, b2_ref, o_ref):
    # Weights are VMEM-resident (constant block index across the row grid):
    # one full-d_ff pass per row tile. Mosaic tiles the MXU internally; on
    # v7x the MRB absorbs the accumulation traffic.
    h = jnp.dot(x_ref[...], w1_ref[...], preferred_element_type=jnp.float32)
    h = jnp.maximum(h + b1_ref[...], 0.0)
    # dropout -> identity (inference semantics)
    y = jnp.dot(h.astype(w2_ref.dtype), w2_ref[...],
                preferred_element_type=jnp.float32)
    o_ref[...] = (y + b2_ref[...]).astype(o_ref.dtype)


def _ffn_streaming_kernel(x_ref, w1_ref, b1_ref, w2_ref, b2_ref, o_ref, acc_ref):
    # Grid = (row tiles [parallel], d_ff tiles [arbitrary/reduction]).
    j = pl.program_id(1)

    @pl.when(j == 0)
    def _():
        acc_ref[...] = jnp.zeros_like(acc_ref)

    h = jnp.dot(x_ref[...], w1_ref[...], preferred_element_type=jnp.float32)
    h = jnp.maximum(h + b1_ref[...], 0.0)
    # dropout -> identity (inference semantics)
    acc_ref[...] += jnp.dot(h.astype(w2_ref.dtype), w2_ref[...],
                            preferred_element_type=jnp.float32)

    @pl.when(j == pl.num_programs(1) - 1)
    def _():
        o_ref[...] = (acc_ref[...] + b2_ref[...]).astype(o_ref.dtype)


def positionwise_ffn(x, w1, b1, w2, b2, *, dropout_p=0.0, training=False,
                     tm=512, tf=1024, compute_dtype=None,
                     force_streaming=False):
    """x: (..., d_model). w1: (d_model, d_ff). w2: (d_ff, d_model)."""
    if training and dropout_p > 0.0:
        # TODO(synk): training-mode dropout (pltpu.prng_random_bits mask).
        raise NotImplementedError(
            "training-mode dropout not implemented; kernel matches eval() semantics")

    orig_shape = x.shape
    out_dtype = x.dtype
    d_model = orig_shape[-1]
    d_ff = w1.shape[1]

    x2 = x.reshape(-1, d_model)
    if compute_dtype is not None:  # e.g. jnp.bfloat16 (explicit numerics decision)
        x2 = x2.astype(compute_dtype)
        w1 = w1.astype(compute_dtype)
        w2 = w2.astype(compute_dtype)
    n = x2.shape[0]

    x_bytes = jnp.dtype(x2.dtype).itemsize
    w_bytes = jnp.dtype(w1.dtype).itemsize
    o_bytes = jnp.dtype(out_dtype).itemsize

    # ---- lane-dense padding targets (multiples of 128) -------------------
    d_model_p = _round_up(d_model, 128)
    d_ff_p = _round_up(d_ff, 128)

    # ---- row tiling -------------------------------------------------------
    sub = 16 if x2.dtype == jnp.bfloat16 else 8
    tm_eff = _round_up(max(sub, min(tm, n)), sub)
    # Keep >= 2 row tiles whenever possible so the 'parallel' axis can be
    # megacore-sharded on v7x (2 TCs); harmless on single-TC v5e/v6e.
    if -(-n // tm_eff) == 1 and n >= 2 * sub:
        tm_eff = _round_up(-(-n // 2), sub)

    # ---- per-generation VMEM budget ----------------------------------------
    vmem_cap = _vmem_capacity_bytes()
    hard_cap = max(32 * _MIB, vmem_cap - vmem_cap // 8)  # 112 MiB / 56 MiB

    # ---- weights-resident fast path? ----------------------------------------
    resident_bytes = (
        2 * d_model_p * d_ff_p * w_bytes        # w1 (double-buffer safe)
        + 2 * d_ff_p * d_model_p * w_bytes      # w2
        + 2 * (d_ff_p + d_model_p) * 4          # biases (f32)
        + 2 * tm_eff * d_model_p * x_bytes      # x tiles
        + 2 * tm_eff * d_model_p * o_bytes      # out tiles
        + tm_eff * d_ff_p * 4                   # f32 hidden intermediate
    )
    resident = (resident_bytes <= hard_cap) and not force_streaming

    tf_eff = None
    tile_bytes = 0
    if not resident:
        tf_eff = min(tf, d_ff_p)
        while True:
            tile_bytes = (
                2 * tm_eff * d_model_p * x_bytes       # x tiles
                + 2 * d_model_p * tf_eff * w_bytes     # w1 tiles
                + 2 * tf_eff * 4                       # b1 tiles (f32)
                + 2 * tf_eff * d_model_p * w_bytes     # w2 tiles
                + 2 * d_model_p * 4                    # b2 tiles (f32)
                + 2 * tm_eff * d_model_p * o_bytes     # out tiles
                + tm_eff * d_model_p * 4               # f32 accumulator
                + tm_eff * tf_eff * 4                  # f32 hidden tile
            )
            if tile_bytes <= hard_cap or (tf_eff <= 128 and tm_eff <= sub):
                break
            if tf_eff > 128:
                tf_eff = max(128, _round_up(tf_eff // 2, 128))
            else:
                tm_eff = max(sub, _round_up(tm_eff // 2, sub))
        d_ff_p = _round_up(d_ff_p, tf_eff)

    grid0 = -(-n // tm_eff)
    n_pad = grid0 * tm_eff

    # ---- pad operands only when needed (zeros don't affect real outputs) ---
    x2p = _maybe_pad2(x2, n_pad, d_model_p)
    w1p = _maybe_pad2(w1, d_model_p, d_ff_p)
    w2p = _maybe_pad2(w2, d_ff_p, d_model_p)
    b1p = _maybe_pad2(b1.reshape(1, d_ff).astype(jnp.float32), 1, d_ff_p)
    b2p = _maybe_pad2(b2.reshape(1, d_model).astype(jnp.float32), 1, d_model_p)

    flops = 4 * n_pad * d_model_p * d_ff_p  # two matmuls, 2*M*K*N each

    if resident:
        bytes_accessed = (
            n_pad * d_model_p * x_bytes
            + 2 * d_model_p * d_ff_p * w_bytes          # weights read once
            + (d_ff_p + d_model_p) * 4
            + n_pad * d_model_p * o_bytes
        )
        out = pl.pallas_call(
            _ffn_resident_kernel,
            out_shape=jax.ShapeDtypeStruct((n_pad, d_model_p), out_dtype),
            grid_spec=pltpu.PrefetchScalarGridSpec(
                num_scalar_prefetch=0,
                grid=(grid0,),
                in_specs=[
                    pl.BlockSpec((tm_eff, d_model_p), lambda i: (i, 0)),   # x
                    pl.BlockSpec((d_model_p, d_ff_p), lambda i: (0, 0)),   # w1
                    pl.BlockSpec((1, d_ff_p), lambda i: (0, 0)),           # b1
                    pl.BlockSpec((d_ff_p, d_model_p), lambda i: (0, 0)),   # w2
                    pl.BlockSpec((1, d_model_p), lambda i: (0, 0)),        # b2
                ],
                out_specs=pl.BlockSpec((tm_eff, d_model_p), lambda i: (i, 0)),
            ),
            compiler_params=pltpu.CompilerParams(
                dimension_semantics=("parallel",),
                vmem_limit_bytes=int(min(hard_cap,
                                         max(32 * _MIB, resident_bytes + 4 * _MIB))),
            ),
            cost_estimate=pl.CostEstimate(flops=int(flops), transcendentals=0,
                                          bytes_accessed=int(bytes_accessed)),
        )(x2p, w1p, b1p, w2p, b2p)
    else:
        bytes_accessed = (
            n_pad * d_model_p * x_bytes
            + grid0 * 2 * d_model_p * d_ff_p * w_bytes  # weights re-streamed / row tile
            + grid0 * (d_ff_p + d_model_p) * 4
            + n_pad * d_model_p * o_bytes
        )
        out = pl.pallas_call(
            _ffn_streaming_kernel,
            out_shape=jax.ShapeDtypeStruct((n_pad, d_model_p), out_dtype),
            grid_spec=pltpu.PrefetchScalarGridSpec(
                num_scalar_prefetch=0,
                grid=(grid0, d_ff_p // tf_eff),
                in_specs=[
                    pl.BlockSpec((tm_eff, d_model_p), lambda i, j: (i, 0)),  # x
                    pl.BlockSpec((d_model_p, tf_eff), lambda i, j: (0, j)),  # w1
                    pl.BlockSpec((1, tf_eff), lambda i, j: (0, j)),          # b1
                    pl.BlockSpec((tf_eff, d_model_p), lambda i, j: (j, 0)),  # w2
                    pl.BlockSpec((1, d_model_p), lambda i, j: (0, 0)),       # b2
                ],
                out_specs=pl.BlockSpec((tm_eff, d_model_p), lambda i, j: (i, 0)),
                scratch_shapes=[pltpu.VMEM((tm_eff, d_model_p), jnp.float32)],
            ),
            compiler_params=pltpu.CompilerParams(
                dimension_semantics=("parallel", "arbitrary"),
                vmem_limit_bytes=int(min(hard_cap,
                                         max(32 * _MIB, tile_bytes + 4 * _MIB))),
            ),
            cost_estimate=pl.CostEstimate(flops=int(flops), transcendentals=0,
                                          bytes_accessed=int(bytes_accessed)),
        )(x2p, w1p, b1p, w2p, b2p)

    if n_pad != n or d_model_p != d_model:
        out = out[:n, :d_model]
    return out.reshape(orig_shape)


if __name__ == "__main__":
    # Small shapes consistent with the module: (batch, seq, d_model)
    batch, seq, d_model, d_ff = 2, 8, 32, 64

    key = jax.random.PRNGKey(0)
    kx, kw1, kb1, kw2, kb2 = jax.random.split(key, 5)

    x = jax.random.normal(kx, (batch, seq, d_model), dtype=jnp.float32)

    # Deterministic parameter init (nn.Linear(d_model,d_ff)/(d_ff,d_model) shapes),
    # stored transposed relative to PyTorch's .weight so kernel computes x @ W + b.
    bound1 = 1.0 / (d_model ** 0.5)
    w1 = jax.random.uniform(kw1, (d_model, d_ff), jnp.float32, -bound1, bound1)
    b1 = jax.random.uniform(kb1, (d_ff,), jnp.float32, -bound1, bound1)
    bound2 = 1.0 / (d_ff ** 0.5)
    w2 = jax.random.uniform(kw2, (d_ff, d_model), jnp.float32, -bound2, bound2)
    b2 = jax.random.uniform(kb2, (d_model,), jnp.float32, -bound2, bound2)

    ref = jnp.maximum(x @ w1 + b1, 0.0) @ w2 + b2

    # Resident (fast) path — chosen automatically for these shapes.
    y = positionwise_ffn(x, w1, b1, w2, b2)
    y = jax.block_until_ready(y)
    assert y.shape == x.shape
    assert jnp.allclose(y, ref, atol=2e-5, rtol=2e-5)

    # Streaming (d_ff-tiled) path — forced, to validate both code paths.
    y2 = positionwise_ffn(x, w1, b1, w2, b2, force_streaming=True)
    y2 = jax.block_until_ready(y2)
    assert jnp.allclose(y2, ref, atol=2e-5, rtol=2e-5)

    print("KERNEL_OK")
</pallas_src>

<mosaic_0001>
module attributes {stable_mosaic.version = 11 : i64} {
  func.func @_ffn_resident_kernel(%arg0: i32, %arg1: memref<8x128xf32, #tpu.memory_space<vmem>>, %arg2: memref<128x128xf32, #tpu.memory_space<vmem>>, %arg3: memref<1x128xf32, #tpu.memory_space<vmem>>, %arg4: memref<128x128xf32, #tpu.memory_space<vmem>>, %arg5: memref<1x128xf32, #tpu.memory_space<vmem>>, %arg6: memref<8x128xf32, #tpu.memory_space<vmem>>) attributes {dimension_semantics = [#tpu.dimension_semantics<parallel>], iteration_bounds = array<i64: 2>, scalar_prefetch = 0 : i64, scratch_operands = 0 : i64, tpu.core_type = #tpu.core_type<tc>, window_params = [{transform_indices = @transform_0, window_bounds = array<i64: 8, 128>}, {pipeline_mode = #tpu.pipeline_mode<synchronous>, transform_indices = @transform_1, window_bounds = array<i64: 128, 128>}, {pipeline_mode = #tpu.pipeline_mode<synchronous>, transform_indices = @transform_2, window_bounds = array<i64: 1, 128>}, {pipeline_mode = #tpu.pipeline_mode<synchronous>, transform_indices = @transform_3, window_bounds = array<i64: 128, 128>}, {pipeline_mode = #tpu.pipeline_mode<synchronous>, transform_indices = @transform_4, window_bounds = array<i64: 1, 128>}, {transform_indices = @transform_5, window_bounds = array<i64: 8, 128>}]} {
    %c0 = arith.constant 0 : index
    %c0_0 = arith.constant 0 : index
    %0 = vector.load %arg1[%c0, %c0_0] : memref<8x128xf32, #tpu.memory_space<vmem>>, vector<8x128xf32>
    %c0_1 = arith.constant 0 : index
    %c0_2 = arith.constant 0 : index
    %1 = vector.load %arg2[%c0_1, %c0_2] : memref<128x128xf32, #tpu.memory_space<vmem>>, vector<128x128xf32>
    %cst = arith.constant dense<0.000000e+00> : vector<8x128xf32>
    %2 = tpu.matmul %0, %1, %cst {dimension_numbers = #tpu.dot_dimension_numbers<[1], [0], [0], [1], [0, 0, 1, 1], [], []>} : vector<8x128xf32>, vector<128x128xf32>, vector<8x128xf32> -> vector<8x128xf32>
    %c0_3 = arith.constant 0 : index
    %c0_4 = arith.constant 0 : index
    %3 = vector.load %arg3[%c0_3, %c0_4] : memref<1x128xf32, #tpu.memory_space<vmem>>, vector<1x128xf32>
    %4 = vector.broadcast %3 : vector<1x128xf32> to vector<8x128xf32>
    %5 = arith.addf %2, %4 : vector<8x128xf32>
    %cst_5 = arith.constant 0.000000e+00 : f32
    %6 = vector.broadcast %cst_5 : f32 to vector<8x128xf32>
    %7 = arith.maximumf %5, %6 : vector<8x128xf32>
    %c0_6 = arith.constant 0 : index
    %c0_7 = arith.constant 0 : index
    %8 = vector.load %arg4[%c0_6, %c0_7] : memref<128x128xf32, #tpu.memory_space<vmem>>, vector<128x128xf32>
    %cst_8 = arith.constant dense<0.000000e+00> : vector<8x128xf32>
    %9 = tpu.matmul %7, %8, %cst_8 {dimension_numbers = #tpu.dot_dimension_numbers<[1], [0], [0], [1], [0, 0, 1, 1], [], []>} : vector<8x128xf32>, vector<128x128xf32>, vector<8x128xf32> -> vector<8x128xf32>
    %c0_9 = arith.constant 0 : index
    %c0_10 = arith.constant 0 : index
    %10 = vector.load %arg5[%c0_9, %c0_10] : memref<1x128xf32, #tpu.memory_space<vmem>>, vector<1x128xf32>
    %11 = vector.broadcast %10 : vector<1x128xf32> to vector<8x128xf32>
    %12 = arith.addf %9, %11 : vector<8x128xf32>
    %c0_11 = arith.constant 0 : index
    %c0_12 = arith.constant 0 : index
    %13 = vector.load %arg6[%c0_11, %c0_12] : memref<8x128xf32, #tpu.memory_space<vmem>>, vector<8x128xf32>
    tpu.vector_store %arg6[%c0_11, %c0_12], %12 {strides = array<i32>} : memref<8x128xf32, #tpu.memory_space<vmem>>, vector<8x128xf32>,
    return
  }
  func.func @transform_0(%arg0: i32) -> (i32, i32) {
    %c0_i32 = arith.constant 0 : i32
    %c0_i32_0 = arith.constant 0 : i32
    return %arg0, %c0_i32 : i32, i32
  }
  func.func @transform_1(%arg0: i32) -> (i32, i32) {
    %c0_i32 = arith.constant 0 : i32
    %c0_i32_0 = arith.constant 0 : i32
    %c0_i32_1 = arith.constant 0 : i32
    return %c0_i32, %c0_i32_0 : i32, i32
  }
  func.func @transform_2(%arg0: i32) -> (i32, i32) {
    %c0_i32 = arith.constant 0 : i32
    %c0_i32_0 = arith.constant 0 : i32
    %c0_i32_1 = arith.constant 0 : i32
    return %c0_i32, %c0_i32_0 : i32, i32
  }
  func.func @transform_3(%arg0: i32) -> (i32, i32) {
    %c0_i32 = arith.constant 0 : i32
    %c0_i32_0 = arith.constant 0 : i32
    %c0_i32_1 = arith.constant 0 : i32
    return %c0_i32, %c0_i32_0 : i32, i32
  }
  func.func @transform_4(%arg0: i32) -> (i32, i32) {
    %c0_i32 = arith.constant 0 : i32
    %c0_i32_0 = arith.constant 0 : i32
    %c0_i32_1 = arith.constant 0 : i32
    return %c0_i32, %c0_i32_0 : i32, i32
  }
  func.func @transform_5(%arg0: i32) -> (i32, i32) {
    %c0_i32 = arith.constant 0 : i32
    %c0_i32_0 = arith.constant 0 : i32
    return %arg0, %c0_i32 : i32, i32
  }
}

</mosaic_0001>

<bundles_post_ra>
// kernel: tpu_custom_call.1
= control target key start
LH: loop header
LB: loop body
LE: loop exit
PB: predicated region body
PF: predicated region fallthrough
CT: control target
= control target key end

     0   :  { %10 = vsyncpa [#allocation3], 0  ;;  %s1258_s0 = inlined_call_operand.hbm [shape: f32[16,128], index: 0, kind: input, shape index: {}]   ;;  %s1259_s1 = inlined_call_operand.hbm [shape: f32[128,128], index: 1, kind: input, shape index: {}]   ;;  %s1260_s2 = inlined_call_operand.vmem [shape: f32[1,128], index: 2, kind: input, shape index: {}]   ;;  %s1261_s3 = inlined_call_operand.hbm [shape: f32[128,128], index: 3, kind: input, shape index: {}]   ;;  %s1262_s4 = inlined_call_operand.vmem [shape: f32[1,128], index: 4, kind: input, shape index: {}]   ;;  %s1263_s5 = inlined_call_operand.hbm [shape: f32[16,128], index: 5, kind: output, shape index: {}]  }
   0x1   :  { %12 = vsyncpa [#allocation3 + $0x1], 0 }
   0x2   :  { %13 = vsyncpa [#allocation6], 0 }
   0x3   :  { %14 = vsyncpa [#allocation4], 0 }
   0x4   :  { %16 = vsyncpa [#allocation4 + $0x1], 0  ;;  %s1000_s18 = smov 0   ;;  %s1002_s19 = smov 0  }
   0x5   :  { %s1004_s20 = smov 0   ;;  %s1006_s21 = smov 0  }
   0x6 LB: > { %s1021_s22 = sadd.s32 4294967295, %s959_s21   ;;  %s561_s23 = sadd.s32 4294967294, %s959_s21   ;;  %s959_s21 = sphi %s1006_s21, %s1283_s21   ;;  %s955_s20 = sphi %s1004_s20, %s1282_s20   ;;  %s951_s19 = sphi %s1002_s19, %s1281_s19   ;;  %s947_s18 = sphi %s1000_s18, %s1280_s18  }
   0x7   : > { %p42_p0 = scmp.ne.s32.totalorder %s951_s19, %s947_s18  ;;  %p1264_p1 = scmp.eq.s32.totalorder %s1021_s22, 0 }
   0x8   : > { %p156_p3 = scmp.eq.s32.totalorder %s561_s23, 1  ;;  %p562_p5 = scmp.ge.s32.totalorder %s959_s21, 1 }
   0x9   : > { %p1030_p4 = por %p1264_p1, %p42_p0  ;;  %p163_p7 = scmp.lt.s32.totalorder %s959_s21, 3 }
   0xa   : > { %p1035_p6 = por %p156_p3, %p42_p0  ;;  %s961_s27 = smov [#allocation5]  }
   0xb   : > { %s1267_s24 = scalar_select %p1030_p4, 1, 0 }
   0xc   : > { %s1268_s25 = scalar_select %p1035_p6, 1, 0 }
   0xd   : > { %p1040_p8 = pnand %p562_p5, %p163_p7  ;;  %s175_s28 = sshll.u32 %s961_s27, 4  ;;  %s1044_s28 = int_to_ptr.vmem [resolvable:$true] %s175_s28 }
   0xe   : > { %s962_s30 = smov [#allocation7]   ;;  %s803_s9 = scalar_lea.hbm %s1259_s1, 2048 }
   0xf   : > { %p743_p9 = pneg %p1040_p8  ;;  %s191_s6 = sshll.u32 %s962_s30, 4  ;;  %s1055_s6 = int_to_ptr.vmem [resolvable:$true] %s191_s6 }
  0x10   : > { %p804_p12 = scmp.ne.s32.totalorder %s1259_s1, %s803_s9  ;;  %p810_p5 = scmp.lt.u32.totalorder %s803_s9, %s1259_s1 }
  0x11   : > { %p1051_p11 = pnand %p743_p9, %p1264_p1 }
  0x13   : > { %p805_p13 = pneg %p1051_p11 }
  0x15   : > { %p806_p0 = pnand %p805_p13, %p804_p12 }
  0x17   : > { %p807_p3 = pneg %p806_p0 }
  0x19   : > { %p812_p7 = pnand %p810_p5, %p807_p3 }
  0x1b   : > { %815 = shalt.err (!%p812_p7)
}
  0x1c   : > { %s816_s14 = scalar_lea.vmem %s1044_s28, 2048  ;;  %p824_p2 = scmp.lt.s32.totalorder %s1044_s28, %s1044_s28 }
  0x1d   : > { %p817_p9 = scmp.ne.s32.totalorder %s1044_s28, %s816_s14  ;;  %p825_p12 = scmp.lt.s32.totalorder %s816_s14, %s816_s14 }
  0x1f   : > { %p819_p10 = pnand %p817_p9, %p805_p13  ;;  %p826_p0 = por %p825_p12, %p824_p2 }
  0x21   : > { %p820_p1 = pneg %p819_p10 }
  0x23   : > { %p827_p6 = pnand %p826_p0, %p820_p1 }
  0x25   : > { %830 = shalt.err (!%p827_p6)
}
  0x26   : > { %s963_s15 = smov 128   ;;  %s964_s16 = smov 8  }
  0x27   : > { %746 = dma.hbm_to_vmem [thread:$0]  (!%p1051_p11), %s1259_s1, 2048, %s1044_s28, [#allocation6], %s963_s15, %s963_s15, %s964_s16  }
  0x28   : > { %s831_s7 = scalar_lea.hbm %s1261_s3, 2048 }
  0x29   : > { %p832_p2 = scmp.ne.s32.totalorder %s1261_s3, %s831_s7  ;;  %p838_p10 = scmp.lt.u32.totalorder %s831_s7, %s1261_s3 }
  0x2b   : > { %p834_p1 = pnand %p832_p2, %p805_p13 }
  0x2d   : > { %p835_p6 = pneg %p834_p1 }
  0x2f   : > { %p840_p3 = pnand %p838_p10, %p835_p6 }
  0x31   : > { %843 = shalt.err (!%p840_p3)
}
  0x32   : > { %s844_s28 = scalar_lea.vmem %s1055_s6, 2048  ;;  %p852_p12 = scmp.lt.s32.totalorder %s1055_s6, %s1055_s6 }
  0x33   : > { %p845_p5 = scmp.ne.s32.totalorder %s1055_s6, %s844_s28  ;;  %p853_p0 = scmp.lt.s32.totalorder %s844_s28, %s844_s28 }
  0x35   : > { %p847_p7 = pnand %p845_p5, %p805_p13  ;;  %p854_p2 = por %p853_p0, %p852_p12 }
  0x37   : > { %p848_p9 = pneg %p847_p7 }
  0x39   : > { %p855_p1 = pnand %p854_p2, %p848_p9 }
  0x3b   : > { %858 = shalt.err (!%p855_p1)
}
  0x3c   : > { %749 = dma.hbm_to_vmem [thread:$0]  (!%p1051_p11), %s1261_s3, 2048, %s1055_s6, [#allocation6], %s963_s15, %s963_s15, %s964_s16  }
  0x3d   : > { %s1110_s14 = sadd.s32 1, %s959_s21   ;;  %s29_s29 = sadd.s32 1, %s955_s20 }
  0x3e   : > { %s26_s17 = ssub.s32 %s959_s21, %s1110_s14  ;;  %p36_p13 = scmp.ne.s32.totalorder %s955_s20, %s951_s19 }
  0x3f   : > { %p27_p6 = scmp.eq.s32.totalorder %s26_s17, 0  ;;  %p37_p10 = scmp.eq.s32.totalorder %s959_s21, 0 }
  0x40   : > { %p1271_p3 = scmp.eq.s32.totalorder %s1021_s22, 1  ;;  %p760_p7 = scmp.lt.s32.totalorder %s959_s21, 2 }
  0x41   : > { %s1126_s27 = scalar_select %p27_p6, %s955_s20, %s29_s29  }
  0x42   : > { %p1120_p5 = por %p1271_p3, %p36_p13  ;;  %p38_p9 = por %p37_p10, %p36_p13 }
  0x43   : > { %s208_s30 = sand.u32 1, %s955_s20   ;;  %s567_s6 = sshll.u32 %s959_s21, 7 }
  0x44   : > { %s1272_s23 = scalar_select %p1120_p5, 1, 0 }
  0x45   : > { %s566_s7 = sshll.u32 %s208_s30, 3  ;;  %s1133_s8 = scalar_lea.hbm %s1258_s0, %s567_s6 }
  0x46   : > { %s212_s9 = scalar_lea.vmem [#allocation2], %s566_s7  ;;  %p1137_p11 = pnand %p760_p7, %p38_p9 }
  0x47   : > { %s219_s10 = sshll.u32 %s212_s9, 4  ;;  %s209_s28 = scalar_lea.sflag [#allocation3], %s208_s30  ;;  %s1135_s10 = int_to_ptr.vmem [resolvable:$true] %s219_s10 }
  0x48   : > { %s859_s12 = scalar_lea.hbm %s1133_s8, 128  ;;  %p861_p0 = pneg %p1137_p11 }
  0x49   : > { %p860_p12 = scmp.ne.s32.totalorder %s1133_s8, %s859_s12  ;;  %s864_s17 = scalar_lea.hbm %s1258_s0, 256 }
  0x4a   : > { %p865_p13 = scmp.lt.u32.totalorder %s1133_s8, %s1258_s0  ;;  %p866_p6 = scmp.lt.u32.totalorder %s864_s17, %s859_s12 }
  0x4b   : > { %p862_p2 = pnand %p861_p0, %p860_p12  ;;  %p868_p3 = scmp.lt.u32.totalorder %s859_s12, %s1133_s8 }
  0x4c   : > { %p867_p10 = por %p866_p6, %p865_p13 }
  0x4d   : > { %p863_p1 = pneg %p862_p2 }
  0x4e   : > { %p869_p7 = por %p868_p3, %p867_p10 }
  0x50   : > { %p870_p9 = pnand %p869_p7, %p863_p1 }
  0x52   : > { %873 = shalt.err (!%p870_p9)
}
  0x53   : > { %s874_s30 = scalar_lea.vmem %s1135_s10, 128  ;;  %s965_s15 = smov [#allocation2]  }
  0x54   : > { %p875_p12 = scmp.ne.s32.totalorder %s1135_s10, %s874_s30  ;;  %s879_s16 = sshll.u32 %s965_s15, 4  ;;  %s880_s16 = int_to_ptr.vmem [resolvable:$false] %s879_s16 }
  0x55   : > { %s881_s9 = scalar_lea.vmem %s880_s16, 256  ;;  %p882_p4 = scmp.lt.s32.totalorder %s1135_s10, %s880_s16 }
  0x56   : > { %p877_p2 = pnand %p875_p12, %p861_p0  ;;  %p883_p13 = scmp.lt.s32.totalorder %s881_s9, %s874_s30 }
  0x58   : > { %p878_p5 = pneg %p877_p2  ;;  %p884_p6 = por %p883_p13, %p882_p4 }
  0x5a   : > { %p885_p10 = pnand %p884_p6, %p878_p5 }
  0x5c   : > { %888 = shalt.err (!%p885_p10)
}
  0x5d   : > { %753 = dma.hbm_to_vmem [thread:$0]  (!%p1137_p11), %s1133_s8, 128, %s1135_s10, %s209_s28  }
  0x5e   : > { %228 = sbr.rel (%p1040_p8) target bundleno = 583 (0x247), region = 40  ;;  %s1169_s12 = sand.u32 (!%p1040_p8), 1, %s951_s19  }
  0x5f   : > { %s569_s13 = sshll.u32 (!%p1040_p8), %s1169_s12, 3  ;;  %s231_s29 = scalar_lea.sflag (!%p1040_p8), [#allocation3], %s1169_s12 }
  0x60   : > { %s1175_s17 = scalar_lea.vmem (!%p1040_p8), [#allocation2], %s569_s13  ;;  %p1274_p4 = scmp.ne.s32.totalorder (!%p1040_p8), %s1267_s24, 0 }
  0x65   : > { %934 = dma.done.wait (%p1274_p4), %s231_s29, 128  }
  0x66   : > { %936 = vsyncadd (%p1274_p4), %s231_s29, 4294967168  ;;  %p1275_p5 = scmp.eq.s32.totalorder %s1021_s22, 0 }
  0x68   : > { %938 = dma.done.wait (%p1275_p5), [#allocation6], 4096   ;;  %p1276_p8 = pmov %p1275_p5 }
  0x69   : > { %v966_v0 = vmov 0.0|0.0   ;;  %vm967_vm0 = vmmov 0   ;;  %v968_v1 = vmov 0.0   ;;  %v270_v2 = vld [vmem:[#allocation5] sm:$0xff]  ;;  %v271_v3 = vld [vmem:[#allocation5 + $0x8] sm:$0xff]  ;;  %v272_v4 = vld [vmem:[#allocation5 + $0x10] sm:$0xff] }
  0x6a   : > { %940 = vsyncadd (%p1276_p8), [#allocation6], 4294963200  ;;  %683 = vmatprep.subr.bf16.mxu0 %v966_v0  ;;  %645 = vmatprep.mubr.msk.f32.mxu0 %vm967_vm0, %v968_v1  ;;  %v684_v5 = vpack.c.bf16 %v271_v3, %v270_v2  ;;  %v273_v6 = vld [vmem:[#allocation5 + $0x18] sm:$0xff]  ;;  %v274_v8 = vld [vmem:[#allocation5 + $0x20] sm:$0xff]  ;;  %s576_s11 = sshll.u32 %s1021_s22, 7  ;;  %s268_s28 = scalar_lea.vmem [#allocation8], %s569_s13 }
  0x6b   : > { %707 = vmatprep.subr.bf16.mxu1 %v966_v0  ;;  %680 = vmatprep.mubr.msk.f32.mxu1 %vm967_vm0, %v968_v1  ;;  %v687_v7 = vpack.c.bf16 %v273_v6, %v272_v4  ;;  %v275_v9 = vld [vmem:[#allocation5 + $0x28] sm:$0xff]  ;;  %v364_v10 = vld [vmem:[#allocation7] sm:$0xff]  ;;  %v366_v12 = vld [vmem:[#allocation7 + $0x10] sm:$0xff]  ;;  %s472_s7 = sshll.u32 %s268_s28, 4  ;;  %s1214_s15 = scalar_lea.hbm %s1263_s5, %s576_s11  ;;  %s1216_s7 = int_to_ptr.vmem [resolvable:$true] %s472_s7 }
  0x6c   : > { %685 = vmatpush3.bf16.msra.mxu0 %v684_v5  ;;  %v365_v11 = vld [vmem:[#allocation7 + $0x8] sm:$0xff]  ;;  %v367_v13 = vld [vmem:[#allocation7 + $0x18] sm:$0xff]  ;;  %v690_v14 = vpack.c.bf16 %v275_v9, %v274_v8  ;;  %v276_v16 = vld [vmem:[#allocation5 + $0x30] sm:$0xff]  ;;  %s459_s16 = scalar_lea.sflag [#allocation4], %s1169_s12  ;;  %s889_s9 = scalar_lea.vmem %s1216_s7, 128 }
  0x6d   : > { %686 = vmatprep.subr.bf16.mxu0 %v966_v0  ;;  %v708_v15 = vpack.c.bf16 %v365_v11, %v364_v10  ;;  %v277_v17 = vld [vmem:[#allocation5 + $0x38] sm:$0xff]  ;;  %v711_v18 = vpack.c.bf16 %v367_v13, %v366_v12  ;;  %v368_v19 = vld [vmem:[#allocation7 + $0x20] sm:$0xff]  ;;  %v369_v20 = vld [vmem:[#allocation7 + $0x28] sm:$0xff]  ;;  %p890_p11 = scmp.ne.s32.totalorder %s1216_s7, %s889_s9  ;;  %p1277_p0 = scmp.ne.s32.totalorder %s1272_s23, 0 }
  0x6e   : > { %v693_v21 = vpack.c.bf16 %v277_v17, %v276_v16  ;;  %v278_v22 = vld [vmem:[#allocation5 + $0x40] sm:$0xff]  ;;  %v279_v23 = vld [vmem:[#allocation5 + $0x48] sm:$0xff]  ;;  %v714_v24 = vpack.c.bf16 %v369_v20, %v368_v19  ;;  %v370_v25 = vld [vmem:[#allocation7 + $0x30] sm:$0xff]  ;;  %s969_s22 = smov [#allocation8]  }
  0x6f   : > { %709 = vmatpush3.bf16.msra.mxu1 %v708_v15  ;;  %v371_v26 = vld [vmem:[#allocation7 + $0x38] sm:$0xff]  ;;  %v696_v27 = vpack.c.bf16 %v279_v23, %v278_v22  ;;  %v280_v28 = vld [vmem:[#allocation5 + $0x50] sm:$0xff]  ;;  %v372_v31 = vld [vmem:[#allocation7 + $0x40] sm:$0xff]  ;;  %p891_p1 = pnand %p890_p11, %p1277_p0  ;;  %s893_s13 = sshll.u32 %s969_s22, 4  ;;  %s894_s13 = int_to_ptr.vmem [resolvable:$false] %s893_s13 }
  0x70   : > { %688 = vmatpush3.bf16.msra.mxu0 %v687_v7  ;;  %710 = vmatprep.subr.bf16.mxu1 %v966_v0  ;;  %v281_v29 = vld [vmem:[#allocation5 + $0x58] sm:$0xff]  ;;  %v717_v30 = vpack.c.bf16 %v371_v26, %v370_v25  ;;  %v373_v32 = vld [vmem:[#allocation7 + $0x48] sm:$0xff]  ;;  %v282_v34 = vld [vmem:[#allocation5 + $0x60] sm:$0xff]  ;;  %s895_s29 = scalar_lea.vmem %s894_s13, 256  ;;  %p896_p7 = scmp.lt.s32.totalorder %s1216_s7, %s894_s13 }
  0x71   : > { %689 = vmatprep.subr.bf16.mxu0 %v966_v0  ;;  %v699_v33 = vpack.c.bf16 %v281_v29, %v280_v28  ;;  %v283_v35 = vld [vmem:[#allocation5 + $0x68] sm:$0xff]  ;;  %v720_v36 = vpack.c.bf16 %v373_v32, %v372_v31  ;;  %v374_v37 = vld [vmem:[#allocation7 + $0x50] sm:$0xff]  ;;  %v375_v38 = vld [vmem:[#allocation7 + $0x58] sm:$0xff]  ;;  %p892_p3 = pneg %p891_p1  ;;  %p897_p9 = scmp.lt.s32.totalorder %s895_s29, %s889_s9 }
  0x72   : > { %v702_v39 = vpack.c.bf16 %v283_v35, %v282_v34  ;;  %v284_v40 = vld [vmem:[#allocation5 + $0x70] sm:$0xff]  ;;  %v285_v41 = vld [vmem:[#allocation5 + $0x78] sm:$0xff]  ;;  %v723_v42 = vpack.c.bf16 %v375_v38, %v374_v37  ;;  %v376_v43 = vld [vmem:[#allocation7 + $0x60] sm:$0xff] }
  0x73   : > { %712 = vmatpush3.bf16.msra.mxu1 %v711_v18  ;;  %v377_v44 = vld [vmem:[#allocation7 + $0x68] sm:$0xff]  ;;  %v705_v45 = vpack.c.bf16 %v285_v41, %v284_v40  ;;  %v269_v47 = vld [vmem:[%s1175_s17] sm:$0xff]  ;;  %p898_p12 = por %p897_p9, %p896_p7 }
  0x74   : > { %691 = vmatpush3.bf16.msra.mxu0 %v690_v14  ;;  %713 = vmatprep.subr.bf16.mxu1 %v966_v0  ;;  %v726_v46 = vpack.c.bf16 %v377_v44, %v376_v43  ;;  %v378_v48 = vld [vmem:[#allocation7 + $0x70] sm:$0xff]  ;;  %v379_v49 = vld [vmem:[#allocation7 + $0x78] sm:$0xff] }
  0x75   : > { %692 = vmatprep.subr.bf16.mxu0 %v966_v0  ;;  %v729_v50 = vpack.c.bf16 %v379_v49, %v378_v48  ;;  %v573_v51 = vld [vmem:[%s1260_s2] ss:$0 sm:$0xff]  ;;  %p899_p2 = pnand %p898_p12, %p892_p3 }
  0x76   : > { %v574_v56 = vld [vmem:[%s1262_s4] ss:$0 sm:$0xff] }
  0x77   : > { %715 = vmatpush3.bf16.msra.mxu1 %v714_v24 }
  0x78   : > { %694 = vmatpush3.bf16.msra.mxu0 %v693_v21  ;;  %716 = vmatprep.subr.bf16.mxu1 %v966_v0 }
  0x79   : > { %695 = vmatprep.subr.bf16.mxu0 %v966_v0 }
  0x7b   : > { %718 = vmatpush3.bf16.msra.mxu1 %v717_v30 }
  0x7c   : > { %697 = vmatpush3.bf16.msra.mxu0 %v696_v27  ;;  %719 = vmatprep.subr.bf16.mxu1 %v966_v0 }
  0x7d   : > { %698 = vmatprep.subr.bf16.mxu0 %v966_v0 }
  0x7f   : > { %721 = vmatpush3.bf16.msra.mxu1 %v720_v36 }
  0x80   : > { %700 = vmatpush3.bf16.msra.mxu0 %v699_v33  ;;  %722 = vmatprep.subr.bf16.mxu1 %v966_v0 }
  0x81   : > { %701 = vmatprep.subr.bf16.mxu0 %v966_v0 }
  0x83   : > { %724 = vmatpush3.bf16.msra.mxu1 %v723_v42 }
  0x84   : > { %703 = vmatpush3.bf16.msra.mxu0 %v702_v39  ;;  %725 = vmatprep.subr.bf16.mxu1 %v966_v0 }
  0x85   : > { %704 = vmatprep.subr.bf16.mxu0 %v966_v0 }
  0x87   : > { %727 = vmatpush3.bf16.msra.mxu1 %v726_v46 }
  0x88   : > { %706 = vmatpush3.bf16.msra.mxu0 %v705_v45  ;;  %728 = vmatprep.subr.bf16.mxu1 %v966_v0 }
  0x8b   : > { %646 = vmatmul.mubr.f32.vlgmr.msra.gmra.mrb[0].mxu0 %v269_v47  ;;  %730 = vmatpush3.bf16.msra.mxu1 %v729_v50 }
 0x15e   : > { %v359_v52 = vpop.f32.mrb[0].mxu0 }
 0x15f   : > { %v360_v53 = vadd.f32 %v573_v51, %v359_v52  ;;  %v647_v54 = vpop.f32.mrb[1].mxu0 }
 0x161   : > { %v363_v55 = vmax.f32 %v360_v53, 0.0 }
 0x163   : > { %681 = vmatmul.mubr.f32.vlgmr.msra.gmra.mrb[0].mxu1 %v363_v55 }
 0x236   : > { %v453_v57 = vpop.f32.mrb[0].mxu1 }
 0x237   : > { %v454_v58 = vadd.f32 %v574_v56, %v453_v57  ;;  %v682_v59 = vpop.f32.mrb[1].mxu1 }
 0x239   : > { %457 = vst [vmem:[%s268_s28] sm:$0xff] %v454_v58 }
 0x23a   : > { %902 = shalt.err (!%p899_p2)
}
 0x23b   : > { %s903_s12 = scalar_lea.hbm %s1214_s15, 128  ;;  %s907_s26 = scalar_lea.hbm %s1263_s5, 256 }
 0x23c   : > { %p904_p13 = scmp.ne.s32.totalorder %s1214_s15, %s903_s12  ;;  %p908_p4 = scmp.lt.u32.totalorder %s1214_s15, %s1263_s5 }
 0x23d   : > { %p909_p5 = scmp.lt.u32.totalorder %s907_s26, %s903_s12  ;;  %p911_p11 = scmp.lt.u32.totalorder %s903_s12, %s1214_s15 }
 0x23e   : > { %p905_p6 = pnand %p904_p13, %p1277_p0 }
 0x23f   : > { %p910_p8 = por %p909_p5, %p908_p4 }
 0x240   : > { %p906_p10 = pneg %p905_p6 }
 0x241   : > { %p912_p1 = por %p911_p11, %p910_p8 }
 0x243   : > { %p913_p3 = pnand %p912_p1, %p906_p10 }
 0x245   : > { %916 = shalt.err (!%p913_p3)
}
 0x246   : > { %741 = dma.vmem_to_hbm [thread:$0]  (%p1277_p0), %s1216_s7, 128, %s1214_s15, %s459_s16  }
 0x247 PF: > { %s484_s11 = sand.u32 1, %s947_s18   ;;  %p1278_p7 = scmp.ne.s32.totalorder %s1268_s25, 0 }
 0x248   : > { %p1279_p9 = scmp.ge.s32.totalorder %s959_s21, 2  ;;  %s485_s28 = scalar_lea.sflag [#allocation4], %s484_s11 }
 0x24a   : > { %p755_p12 = pnand %p1279_p9, %p1278_p7 }
 0x24c   : > { %942 = dma.done.wait (!%p755_p12), %s485_s28, 128  }
 0x24d   : > { %944 = vsyncadd (!%p755_p12), %s485_s28, 4294967168  ;;  %p19_p2 = scmp.ge.s32.totalorder %s1110_s14, 4   ;;  %s1280_s18 = smov %s951_s19 }
 0x24e   : > { %s1281_s19 = smov %s955_s20  ;;  %s1282_s20 = smov %s1126_s27 }
 0x24f   : > { %s1283_s21 = smov %s1110_s14  ;;  %21 = sbr.rel (!%p19_p2) target bundleno = 6 (0x6), region = 93 }
 0x256   :  { %490 = vsyncpa [#allocation3], 1 }
 0x257   :  { %492 = vsyncpa [#allocation3 + $0x1], 1 }
 0x258   :  { %493 = vsyncpa [#allocation6], 1 }
 0x259   :  { %494 = vsyncpa [#allocation4], 1 }
 0x25a   :  { %496 = vsyncpa [#allocation4 + $0x1], 1 }

</bundles_post_ra>
